<compile_context>
chip_gen: v5e
topology: v5e:2x2
jax: 0.10.0
libtpu: 0.0.40
codegen_flags: <defaults>
</compile_context>

<pallas_src>
import functools
import math

import jax
import jax.numpy as jnp
from jax.experimental import pallas as pl
from jax.experimental.pallas import tpu as pltpu


# ----------------------------- Pallas kernels -----------------------------

def _router_stats_kernel(logits_ref, used_ref, wts_ref, tgt_ref, *, capacity):
    """Per-token routing statistics.  All data here is O(T*E) (small)."""
    probs = jax.nn.softmax(logits_ref[...].astype(jnp.float32), axis=-1)  # (T,E)
    T, E = probs.shape

    # Prefix-sum helper matrices (2D iotas, consumed by the MXU).
    tri_e = (jax.lax.broadcasted_iota(jnp.int32, (E, E), 0)
             <= jax.lax.broadcasted_iota(jnp.int32, (E, E), 1)).astype(jnp.float32)
    # TODO(synk): the (T,T) token-scan matrix is fine for small/medium T; a
    # chunked scan would be needed for very long token counts (VMEM).
    tri_t = (jax.lax.broadcasted_iota(jnp.int32, (T, T), 1)
             <= jax.lax.broadcasted_iota(jnp.int32, (T, T), 0)).astype(jnp.float32)
    eidx = jax.lax.broadcasted_iota(jnp.int32, (T, E), 1).astype(jnp.float32)

    def first_max_one_hot(v):
        # one-hot of the first maximal entry per row (== torch argmax + one_hot)
        m = jnp.max(v, axis=-1, keepdims=True)
        eq = (v == m).astype(jnp.float32)
        cum = jnp.dot(eq, tri_e, preferred_element_type=jnp.float32)
        return eq * (cum < 1.5).astype(jnp.float32)

    mask1 = first_max_one_hot(probs)                       # top-1 one-hot (T,E)
    masked = jnp.where(mask1 > 0.0, -jnp.inf, probs)       # masked_fill(-inf)
    mask2 = first_max_one_hot(masked)                      # top-2 one-hot (T,E)

    # moe_cumsum(x) = cumsum(x, dim=0) - 1   (sequential scan -> MXU matmul)
    rank1 = jnp.dot(tri_t, mask1, preferred_element_type=jnp.float32) - 1.0
    rank2 = jnp.dot(tri_t, mask2, preferred_element_type=jnp.float32) - 1.0
    rank2 = rank2 + jnp.sum(mask1, axis=0, keepdims=True)  # offset by top-1 counts

    cap = jnp.float32(capacity)
    g1 = mask1 * (rank1 < cap).astype(jnp.float32)         # capacity gating
    g2 = mask2 * (rank2 < cap).astype(jnp.float32)

    used_ref[...] = (jnp.sum(g1, axis=0, keepdims=True)
                     + jnp.sum(g2, axis=0, keepdims=True)).astype(jnp.int32)

    # Per-token scalar combine weights (zero if dropped by capacity).
    w1 = jnp.sum(g1 * probs, axis=-1, keepdims=True)       # (T,1)
    w2 = jnp.sum(g2 * probs, axis=-1, keepdims=True)
    wts_ref[...] = jnp.concatenate([w1, w2], axis=-1)

    # Flattened target column (expert * capacity + rank), -1 when dropped.
    k1 = jnp.sum(g1, axis=-1, keepdims=True)
    k2 = jnp.sum(g2, axis=-1, keepdims=True)
    e1 = jnp.sum(g1 * eidx, axis=-1, keepdims=True)
    e2 = jnp.sum(g2 * eidx, axis=-1, keepdims=True)
    r1 = jnp.sum(g1 * rank1, axis=-1, keepdims=True)
    r2 = jnp.sum(g2 * rank2, axis=-1, keepdims=True)
    t1 = jnp.where(k1 > 0.5, e1 * cap + r1, -1.0)
    t2 = jnp.where(k2 > 0.5, e2 * cap + r2, -1.0)
    tgt_ref[...] = jnp.concatenate([t1, t2], axis=-1).astype(jnp.int32)


def _router_expand_kernel(wts_ref, tgt_ref, cb_ref, sm_ref):
    """Scatter-free expansion to the (tokens, experts*capacity) tensors."""
    tt, ec = cb_ref.shape
    col = jax.lax.broadcasted_iota(jnp.int32, (tt, ec), 1)   # flattened (e, c) col
    t1 = tgt_ref[:, 0:1]
    t2 = tgt_ref[:, 1:2]
    hit1 = col == t1                                         # never true if t == -1
    hit2 = col == t2
    cb_ref[...] = (jnp.where(hit1, wts_ref[:, 0:1], 0.0)
                   + jnp.where(hit2, wts_ref[:, 1:2], 0.0))
    sm_ref[...] = (hit1 | hit2).astype(jnp.int32)


# ------------------------------- wrapper -----------------------------------

def _pick_token_tile(T):
    # largest multiple-of-8 tile that divides T and leaves >= 2 grid steps
    for cand in (1024, 512, 256, 128, 64, 32, 16, 8):
        if cand < T and T % cand == 0:
            return cand
    return T


def pallas_top2_router(logits, *, capacity_factor=2.0, min_capacity=4):
    """HFOpenMoeTop2Router.forward.  logits: (T, E) float32."""
    assert logits.dtype == jnp.float32, "Router input should be FP32"
    T, E = logits.shape

    # get_capacity (host-side static arithmetic, identical to the reference)
    capacity = math.floor(2 * capacity_factor * T / E)
    capacity += capacity % 2
    capacity = max(capacity, min_capacity)
    assert capacity > 0
    C = int(capacity)

    used, wts, tgt = pl.pallas_call(
        functools.partial(_router_stats_kernel, capacity=C),
        grid=(1,),
        in_specs=[pl.BlockSpec((T, E), lambda i: (0, 0))],
        out_specs=[
            pl.BlockSpec((1, E), lambda i: (0, 0)),   # used_capacity
            pl.BlockSpec((T, 2), lambda i: (0, 0)),   # [w1, w2] per token
            pl.BlockSpec((T, 2), lambda i: (0, 0)),   # [t1, t2] flattened targets
        ],
        out_shape=(
            jax.ShapeDtypeStruct((1, E), jnp.int32),
            jax.ShapeDtypeStruct((T, 2), jnp.float32),
            jax.ShapeDtypeStruct((T, 2), jnp.int32),
        ),
        compiler_params=pltpu.CompilerParams(
            dimension_semantics=("arbitrary",)),
    )(logits)

    tt = _pick_token_tile(T)
    EC = E * C
    cb2, sm2 = pl.pallas_call(
        _router_expand_kernel,
        grid=(T // tt,),
        in_specs=[
            pl.BlockSpec((tt, 2), lambda i: (i, 0)),
            pl.BlockSpec((tt, 2), lambda i: (i, 0)),
        ],
        out_specs=[
            pl.BlockSpec((tt, EC), lambda i: (i, 0)),   # lane-dense outputs
            pl.BlockSpec((tt, EC), lambda i: (i, 0)),
        ],
        out_shape=(
            jax.ShapeDtypeStruct((T, EC), jnp.float32),
            jax.ShapeDtypeStruct((T, EC), jnp.int32),
        ),
        compiler_params=pltpu.CompilerParams(
            dimension_semantics=("parallel",)),
    )(wts, tgt)

    used_capacity = used.reshape(E)
    cb_weight = cb2.reshape(T, E, C)
    # sec_mask is produced as int32 inside the kernel (avoids i1-in-memory
    # outputs); the bool cast here is a trivial XLA op.
    sec_mask = sm2.reshape(T, E, C).astype(bool)
    return used_capacity, cb_weight, sec_mask


# ---------------------- pure-JAX reference (for checking) ------------------

def reference_top2_router(logits, capacity):
    probs = jax.nn.softmax(logits, axis=-1)
    T, E = probs.shape
    top1 = jnp.argmax(probs, axis=-1)
    mask1 = jax.nn.one_hot(top1, E, dtype=jnp.int32)
    masked = jnp.where(mask1.astype(bool), -jnp.inf, probs)
    top2 = jnp.argmax(masked, axis=-1)
    mask2 = jax.nn.one_hot(top2, E, dtype=jnp.int32)
    rank1 = jnp.cumsum(mask1, axis=0) - 1
    rank2 = jnp.cumsum(mask2, axis=0) - 1
    rank2 = rank2 + jnp.sum(mask1, axis=0, keepdims=True)
    mask1 = mask1 * (rank1 < capacity).astype(jnp.int32)
    mask2 = mask2 * (rank2 < capacity).astype(jnp.int32)
    used = mask1.sum(axis=0) + mask2.sum(axis=0)
    r1 = jnp.sum(mask1 * rank1, axis=-1)
    r2 = jnp.sum(mask2 * rank2, axis=-1)
    w1 = mask1 * probs
    w2 = mask2 * probs
    idx = jnp.arange(T)
    cb = jnp.zeros((T, E, capacity), jnp.float32)
    cb = cb.at[idx, top1, r1].add(w1[idx, top1])
    cb = cb.at[idx, top2, r2].add(w2[idx, top2])
    sm = jnp.zeros((T, E, capacity), jnp.int32)
    sm = sm.at[idx, top1, r1].add(mask1[idx, top1])
    sm = sm.at[idx, top2, r2].add(mask2[idx, top2])
    return used, cb, sm > 0


if __name__ == "__main__":
    B, S, E = 2, 8, 4            # batch 2 x seq 8 tokens routed over 4 experts
    T = B * S
    key = jax.random.PRNGKey(0)
    logits = jax.random.normal(key, (T, E), dtype=jnp.float32)

    used, cb, sm = pallas_top2_router(logits, capacity_factor=2.0, min_capacity=4)
    used, cb, sm = jax.block_until_ready((used, cb, sm))

    C = cb.shape[-1]
    assert used.shape == (E,) and cb.shape == (T, E, C) and sm.shape == (T, E, C)

    ref_used, ref_cb, ref_sm = reference_top2_router(logits, C)
    assert jnp.array_equal(used, ref_used.astype(used.dtype))
    assert jnp.allclose(cb, ref_cb, atol=1e-5)
    assert jnp.array_equal(sm, ref_sm)
    print("KERNEL_OK")
</pallas_src>

<mosaic_0001>
module attributes {stable_mosaic.version = 11 : i64} {
  func.func @_router_stats_kernel(%arg0: i32, %arg1: memref<16x4xf32, #tpu.memory_space<vmem>>, %arg2: memref<1x4xi32, #tpu.memory_space<vmem>>, %arg3: memref<16x2xf32, #tpu.memory_space<vmem>>, %arg4: memref<16x2xi32, #tpu.memory_space<vmem>>) attributes {dimension_semantics = [#tpu.dimension_semantics<arbitrary>], iteration_bounds = array<i64: 1>, scalar_prefetch = 0 : i64, scratch_operands = 0 : i64, tpu.core_type = #tpu.core_type<tc>, window_params = [{pipeline_mode = #tpu.pipeline_mode<synchronous>, transform_indices = @transform_0, window_bounds = array<i64: 16, 4>}, {pipeline_mode = #tpu.pipeline_mode<synchronous>, transform_indices = @transform_1, window_bounds = array<i64: 1, 4>}, {pipeline_mode = #tpu.pipeline_mode<synchronous>, transform_indices = @transform_2, window_bounds = array<i64: 16, 2>}, {pipeline_mode = #tpu.pipeline_mode<synchronous>, transform_indices = @transform_3, window_bounds = array<i64: 16, 2>}]} {
    %c0 = arith.constant 0 : index
    %c0_0 = arith.constant 0 : index
    %0 = vector.load %arg1[%c0, %c0_0] : memref<16x4xf32, #tpu.memory_space<vmem>>, vector<16x4xf32>
    %cst = arith.constant dense<0xFF800000> : vector<16xf32>
    %1 = vector.multi_reduction <maximumf>, %0, %cst [1] : vector<16x4xf32> to vector<16xf32>
    %cst_1 = arith.constant 0xFF800000 : f32
    %2 = vector.broadcast %cst_1 : f32 to vector<16xf32>
    %3 = arith.maximumf %2, %1 : vector<16xf32>
    %4 = vector.shape_cast %3 : vector<16xf32> to vector<16x1xf32>
    %5 = vector.broadcast %4 : vector<16x1xf32> to vector<16x4xf32>
    %6 = arith.subf %0, %5 : vector<16x4xf32>
    %7 = math.exp %6 : vector<16x4xf32>
    %cst_2 = arith.constant dense<0.000000e+00> : vector<16xf32>
    %8 = vector.multi_reduction <add>, %7, %cst_2 [1] : vector<16x4xf32> to vector<16xf32>
    %9 = vector.shape_cast %8 : vector<16xf32> to vector<16x1xf32>
    %10 = vector.broadcast %9 : vector<16x1xf32> to vector<16x4xf32>
    %11 = arith.divf %7, %10 : vector<16x4xf32>
    %12 = tpu.iota {dimensions = array<i32: 0>} : vector<4x4xi32>
    %13 = tpu.iota {dimensions = array<i32: 1>} : vector<4x4xi32>
    %14 = arith.cmpi sle, %12, %13 : vector<4x4xi32>
    %15 = arith.extui %14 : vector<4x4xi1> to vector<4x4xi32>
    %16 = arith.sitofp %15 : vector<4x4xi32> to vector<4x4xf32>
    %17 = tpu.iota {dimensions = array<i32: 1>} : vector<16x16xi32>
    %18 = tpu.iota {dimensions = array<i32: 0>} : vector<16x16xi32>
    %19 = arith.cmpi sle, %17, %18 : vector<16x16xi32>
    %20 = arith.extui %19 : vector<16x16xi1> to vector<16x16xi32>
    %21 = arith.sitofp %20 : vector<16x16xi32> to vector<16x16xf32>
    %22 = tpu.iota {dimensions = array<i32: 1>} : vector<16x4xi32>
    %23 = arith.sitofp %22 : vector<16x4xi32> to vector<16x4xf32>
    %cst_3 = arith.constant dense<0xFF800000> : vector<16xf32>
    %24 = vector.multi_reduction <maximumf>, %11, %cst_3 [1] : vector<16x4xf32> to vector<16xf32>
    %25 = vector.shape_cast %24 : vector<16xf32> to vector<16x1xf32>
    %26 = vector.broadcast %25 : vector<16x1xf32> to vector<16x4xf32>
    %27 = arith.cmpf oeq, %11, %26 : vector<16x4xf32>
    %28 = arith.extui %27 : vector<16x4xi1> to vector<16x4xi32>
    %29 = arith.sitofp %28 : vector<16x4xi32> to vector<16x4xf32>
    %cst_4 = arith.constant dense<0.000000e+00> : vector<16x4xf32>
    %30 = tpu.matmul %29, %16, %cst_4 {dimension_numbers = #tpu.dot_dimension_numbers<[1], [0], [0], [1], [0, 0, 1, 1], [], []>} : vector<16x4xf32>, vector<4x4xf32>, vector<16x4xf32> -> vector<16x4xf32>
    %cst_5 = arith.constant 1.500000e+00 : f32
    %31 = vector.broadcast %cst_5 : f32 to vector<16x4xf32>
    %32 = arith.cmpf olt, %30, %31 : vector<16x4xf32>
    %33 = arith.extui %32 : vector<16x4xi1> to vector<16x4xi32>
    %34 = arith.sitofp %33 : vector<16x4xi32> to vector<16x4xf32>
    %35 = arith.mulf %29, %34 : vector<16x4xf32>
    %cst_6 = arith.constant 0.000000e+00 : f32
    %36 = vector.broadcast %cst_6 : f32 to vector<16x4xf32>
    %37 = arith.cmpf ogt, %35, %36 : vector<16x4xf32>
    %cst_7 = arith.constant 0xFF800000 : f32
    %38 = vector.broadcast %cst_7 : f32 to vector<16x4xf32>
    %39 = arith.select %37, %38, %11 : vector<16x4xi1>, vector<16x4xf32>
    %cst_8 = arith.constant dense<0xFF800000> : vector<16xf32>
    %40 = vector.multi_reduction <maximumf>, %39, %cst_8 [1] : vector<16x4xf32> to vector<16xf32>
    %41 = vector.shape_cast %40 : vector<16xf32> to vector<16x1xf32>
    %42 = vector.broadcast %41 : vector<16x1xf32> to vector<16x4xf32>
    %43 = arith.cmpf oeq, %39, %42 : vector<16x4xf32>
    %44 = arith.extui %43 : vector<16x4xi1> to vector<16x4xi32>
    %45 = arith.sitofp %44 : vector<16x4xi32> to vector<16x4xf32>
    %cst_9 = arith.constant dense<0.000000e+00> : vector<16x4xf32>
    %46 = tpu.matmul %45, %16, %cst_9 {dimension_numbers = #tpu.dot_dimension_numbers<[1], [0], [0], [1], [0, 0, 1, 1], [], []>} : vector<16x4xf32>, vector<4x4xf32>, vector<16x4xf32> -> vector<16x4xf32>
    %cst_10 = arith.constant 1.500000e+00 : f32
    %47 = vector.broadcast %cst_10 : f32 to vector<16x4xf32>
    %48 = arith.cmpf olt, %46, %47 : vector<16x4xf32>
    %49 = arith.extui %48 : vector<16x4xi1> to vector<16x4xi32>
    %50 = arith.sitofp %49 : vector<16x4xi32> to vector<16x4xf32>
    %51 = arith.mulf %45, %50 : vector<16x4xf32>
    %cst_11 = arith.constant dense<0.000000e+00> : vector<16x4xf32>
    %52 = tpu.matmul %21, %35, %cst_11 {dimension_numbers = #tpu.dot_dimension_numbers<[1], [0], [0], [1], [0, 0, 1, 1], [], []>} : vector<16x16xf32>, vector<16x4xf32>, vector<16x4xf32> -> vector<16x4xf32>
    %cst_12 = arith.constant 1.000000e+00 : f32
    %53 = vector.broadcast %cst_12 : f32 to vector<16x4xf32>
    %54 = arith.subf %52, %53 : vector<16x4xf32>
    %cst_13 = arith.constant dense<0.000000e+00> : vector<16x4xf32>
    %55 = tpu.matmul %21, %51, %cst_13 {dimension_numbers = #tpu.dot_dimension_numbers<[1], [0], [0], [1], [0, 0, 1, 1], [], []>} : vector<16x16xf32>, vector<16x4xf32>, vector<16x4xf32> -> vector<16x4xf32>
    %cst_14 = arith.constant 1.000000e+00 : f32
    %56 = vector.broadcast %cst_14 : f32 to vector<16x4xf32>
    %57 = arith.subf %55, %56 : vector<16x4xf32>
    %cst_15 = arith.constant dense<0.000000e+00> : vector<4xf32>
    %58 = vector.multi_reduction <add>, %35, %cst_15 [0] : vector<16x4xf32> to vector<4xf32>
    %59 = vector.shape_cast %58 : vector<4xf32> to vector<1x4xf32>
    %60 = vector.broadcast %59 : vector<1x4xf32> to vector<16x4xf32>
    %61 = arith.addf %57, %60 : vector<16x4xf32>
    %cst_16 = arith.constant 1.600000e+01 : f32
    %62 = vector.broadcast %cst_16 : f32 to vector<16x4xf32>
    %63 = arith.cmpf olt, %54, %62 : vector<16x4xf32>
    %64 = arith.extui %63 : vector<16x4xi1> to vector<16x4xi32>
    %65 = arith.sitofp %64 : vector<16x4xi32> to vector<16x4xf32>
    %66 = arith.mulf %35, %65 : vector<16x4xf32>
    %cst_17 = arith.constant 1.600000e+01 : f32
    %67 = vector.broadcast %cst_17 : f32 to vector<16x4xf32>
    %68 = arith.cmpf olt, %61, %67 : vector<16x4xf32>
    %69 = arith.extui %68 : vector<16x4xi1> to vector<16x4xi32>
    %70 = arith.sitofp %69 : vector<16x4xi32> to vector<16x4xf32>
    %71 = arith.mulf %51, %70 : vector<16x4xf32>
    %cst_18 = arith.constant dense<0.000000e+00> : vector<4xf32>
    %72 = vector.multi_reduction <add>, %66, %cst_18 [0] : vector<16x4xf32> to vector<4xf32>
    %73 = vector.shape_cast %72 : vector<4xf32> to vector<1x4xf32>
    %cst_19 = arith.constant dense<0.000000e+00> : vector<4xf32>
    %74 = vector.multi_reduction <add>, %71, %cst_19 [0] : vector<16x4xf32> to vector<4xf32>
    %75 = vector.shape_cast %74 : vector<4xf32> to vector<1x4xf32>
    %76 = arith.addf %73, %75 : vector<1x4xf32>
    %77 = arith.fptosi %76 : vector<1x4xf32> to vector<1x4xi32>
    %c0_20 = arith.constant 0 : index
    %c0_21 = arith.constant 0 : index
    %78 = vector.load %arg2[%c0_20, %c0_21] : memref<1x4xi32, #tpu.memory_space<vmem>>, vector<1x4xi32>
    tpu.vector_store %arg2[%c0_20, %c0_21], %77 {strides = array<i32>} : memref<1x4xi32, #tpu.memory_space<vmem>>, vector<1x4xi32>,
    %79 = arith.mulf %66, %11 : vector<16x4xf32>
    %cst_22 = arith.constant dense<0.000000e+00> : vector<16xf32>
    %80 = vector.multi_reduction <add>, %79, %cst_22 [1] : vector<16x4xf32> to vector<16xf32>
    %81 = vector.shape_cast %80 : vector<16xf32> to vector<16x1xf32>
    %82 = arith.mulf %71, %11 : vector<16x4xf32>
    %cst_23 = arith.constant dense<0.000000e+00> : vector<16xf32>
    %83 = vector.multi_reduction <add>, %82, %cst_23 [1] : vector<16x4xf32> to vector<16xf32>
    %84 = vector.shape_cast %83 : vector<16xf32> to vector<16x1xf32>
    %85 = tpu.concatenate %81, %84 in 1 : vector<16x1xf32>, vector<16x1xf32> -> vector<16x2xf32>
    %c0_24 = arith.constant 0 : index
    %c0_25 = arith.constant 0 : index
    %86 = vector.load %arg3[%c0_24, %c0_25] : memref<16x2xf32, #tpu.memory_space<vmem>>, vector<16x2xf32>
    tpu.vector_store %arg3[%c0_24, %c0_25], %85 {strides = array<i32>} : memref<16x2xf32, #tpu.memory_space<vmem>>, vector<16x2xf32>,
    %cst_26 = arith.constant dense<0.000000e+00> : vector<16xf32>
    %87 = vector.multi_reduction <add>, %66, %cst_26 [1] : vector<16x4xf32> to vector<16xf32>
    %88 = vector.shape_cast %87 : vector<16xf32> to vector<16x1xf32>
    %cst_27 = arith.constant dense<0.000000e+00> : vector<16xf32>
    %89 = vector.multi_reduction <add>, %71, %cst_27 [1] : vector<16x4xf32> to vector<16xf32>
    %90 = vector.shape_cast %89 : vector<16xf32> to vector<16x1xf32>
    %91 = arith.mulf %66, %23 : vector<16x4xf32>
    %cst_28 = arith.constant dense<0.000000e+00> : vector<16xf32>
    %92 = vector.multi_reduction <add>, %91, %cst_28 [1] : vector<16x4xf32> to vector<16xf32>
    %93 = vector.shape_cast %92 : vector<16xf32> to vector<16x1xf32>
    %94 = arith.mulf %71, %23 : vector<16x4xf32>
    %cst_29 = arith.constant dense<0.000000e+00> : vector<16xf32>
    %95 = vector.multi_reduction <add>, %94, %cst_29 [1] : vector<16x4xf32> to vector<16xf32>
    %96 = vector.shape_cast %95 : vector<16xf32> to vector<16x1xf32>
    %97 = arith.mulf %66, %54 : vector<16x4xf32>
    %cst_30 = arith.constant dense<0.000000e+00> : vector<16xf32>
    %98 = vector.multi_reduction <add>, %97, %cst_30 [1] : vector<16x4xf32> to vector<16xf32>
    %99 = vector.shape_cast %98 : vector<16xf32> to vector<16x1xf32>
    %100 = arith.mulf %71, %61 : vector<16x4xf32>
    %cst_31 = arith.constant dense<0.000000e+00> : vector<16xf32>
    %101 = vector.multi_reduction <add>, %100, %cst_31 [1] : vector<16x4xf32> to vector<16xf32>
    %102 = vector.shape_cast %101 : vector<16xf32> to vector<16x1xf32>
    %cst_32 = arith.constant 5.000000e-01 : f32
    %103 = vector.broadcast %cst_32 : f32 to vector<16x1xf32>
    %104 = arith.cmpf ogt, %88, %103 : vector<16x1xf32>
    %cst_33 = arith.constant 1.600000e+01 : f32
    %105 = vector.broadcast %cst_33 : f32 to vector<16x1xf32>
    %106 = arith.mulf %93, %105 : vector<16x1xf32>
    %107 = arith.addf %106, %99 : vector<16x1xf32>
    %cst_34 = arith.constant -1.000000e+00 : f32
    %108 = vector.broadcast %cst_34 : f32 to vector<16x1xf32>
    %109 = arith.select %104, %107, %108 : vector<16x1xi1>, vector<16x1xf32>
    %cst_35 = arith.constant 5.000000e-01 : f32
    %110 = vector.broadcast %cst_35 : f32 to vector<16x1xf32>
    %111 = arith.cmpf ogt, %90, %110 : vector<16x1xf32>
    %cst_36 = arith.constant 1.600000e+01 : f32
    %112 = vector.broadcast %cst_36 : f32 to vector<16x1xf32>
    %113 = arith.mulf %96, %112 : vector<16x1xf32>
    %114 = arith.addf %113, %102 : vector<16x1xf32>
    %cst_37 = arith.constant -1.000000e+00 : f32
    %115 = vector.broadcast %cst_37 : f32 to vector<16x1xf32>
    %116 = arith.select %111, %114, %115 : vector<16x1xi1>, vector<16x1xf32>
    %117 = tpu.concatenate %109, %116 in 1 : vector<16x1xf32>, vector<16x1xf32> -> vector<16x2xf32>
    %118 = arith.fptosi %117 : vector<16x2xf32> to vector<16x2xi32>
    %c0_38 = arith.constant 0 : index
    %c0_39 = arith.constant 0 : index
    %119 = vector.load %arg4[%c0_38, %c0_39] : memref<16x2xi32, #tpu.memory_space<vmem>>, vector<16x2xi32>
    tpu.vector_store %arg4[%c0_38, %c0_39], %118 {strides = array<i32>} : memref<16x2xi32, #tpu.memory_space<vmem>>, vector<16x2xi32>,
    return
  }
  func.func @transform_0(%arg0: i32) -> (i32, i32) {
    %c0_i32 = arith.constant 0 : i32
    %c0_i32_0 = arith.constant 0 : i32
    %c0_i32_1 = arith.constant 0 : i32
    return %c0_i32, %c0_i32_0 : i32, i32
  }
  func.func @transform_1(%arg0: i32) -> (i32, i32) {
    %c0_i32 = arith.constant 0 : i32
    %c0_i32_0 = arith.constant 0 : i32
    %c0_i32_1 = arith.constant 0 : i32
    return %c0_i32, %c0_i32_0 : i32, i32
  }
  func.func @transform_2(%arg0: i32) -> (i32, i32) {
    %c0_i32 = arith.constant 0 : i32
    %c0_i32_0 = arith.constant 0 : i32
    %c0_i32_1 = arith.constant 0 : i32
    return %c0_i32, %c0_i32_0 : i32, i32
  }
  func.func @transform_3(%arg0: i32) -> (i32, i32) {
    %c0_i32 = arith.constant 0 : i32
    %c0_i32_0 = arith.constant 0 : i32
    %c0_i32_1 = arith.constant 0 : i32
    return %c0_i32, %c0_i32_0 : i32, i32
  }
}

</mosaic_0001>

<bundles_post_ra>
// kernel: tpu_custom_call.1
= control target key start
LH: loop header
LB: loop body
LE: loop exit
PB: predicated region body
PF: predicated region fallthrough
CT: control target
= control target key end

     0   :  { %vm14_vm0 = vcmask 31744   ;;  %s616_s0 = inlined_call_operand.vmem [shape: f32[16,4], index: 0, kind: input, shape index: {}]   ;;  %s617_s1 = inlined_call_operand.hbm [shape: s32[1,4], index: 1, kind: output, shape index: {0}]   ;;  %s618_s2 = inlined_call_operand.vmem [shape: f32[16,2], index: 2, kind: output, shape index: {1}]   ;;  %s619_s3 = inlined_call_operand.vmem [shape: s32[16,2], index: 3, kind: output, shape index: {2}]  }
   0x1   :  { %v12_v0 = vld [vmem:[%s616_s0] sm:$0xff] }
   0x2   :  { %9 = vsyncpa [#allocation3], 0  ;;  %v15_v1 = vsel %vm14_vm0, %v12_v0, -inf  ;;  %v13_v2 = vld [vmem:[%s616_s0 + $0x8] sm:$0xff]  ;;  %v63_v40 = vlaneseq  ;;  %v478_v43 = vmov 0.0   ;;  %vm96_vm10 = vcmask 1043456  }
   0x3   :  { %16 = vmax.xlane.f32.xlu0 %v15_v1  ;;  %v18_v3 = vsel %vm14_vm0, %v13_v2, -inf  ;;  %s479_s0 = smov [#allocation2]   ;;  %s381_s19 = sshll.u32 %s617_s1, 4  ;;  %s382_s19 = int_to_ptr.hbm [resolvable:$true] %s381_s19 }
   0x4   :  { %v64_v41 = vshrl.u32 %v63_v40, 7  ;;  %v66_v42 = vand.u32 127, %v63_v40  ;;  %s379_s16 = sshll.u32 %s479_s0, 4  ;;  %s380_s16 = int_to_ptr.vmem [resolvable:$true] %s379_s16 }
   0x6   :  { %vm67_vm9 = vcmp.le.s32.totalorder %v64_v41, %v66_v42  ;;  %v70_v59 = vadd.s32 8, %v64_v41 }
   0x7   :  { %v398_v44 = vsel %vm67_vm9, 1.0, %v478_v43 }
   0x8   :  { %403 = vmatpush.msk.msra.mxu0 %vm96_vm10, %v398_v44  ;;  %410 = vmatpush.msk.msra.mxu1 %vm96_vm10, %v398_v44 }
   0xb   :  { %19 = vmax.xlane.f32.xlu0 %v18_v3 }
  0x76   :  { %v17_v4 = vpop.xlane.xlu0 %16 }
  0x77   :  { %v21_v5 = vsub.f32 %v12_v0, %v17_v4  ;;  %v543_v4 = vcvt.s32.f32 %v66_v42 }
  0x79   :  { %v23_v6 = vmul.f32 1.442695, %v21_v5 }
  0x7b   :  { %444 = vpow2.f32 %v23_v6 }
  0x7e   :  { %v20_v7 = vpop.xlane.xlu0 %19 }
  0x7f   :  { %v22_v8 = vsub.f32 %v13_v2, %v20_v7 }
  0x81   :  { %v445_v9 = vpop.eup %444  ;;  %v25_v10 = vmul.f32 1.442695, %v22_v8 }
  0x82   :  { %v27_v11 = vsel %vm14_vm0, %v445_v9, 0.0 }
  0x83   :  { %446 = vpow2.f32 %v25_v10  ;;  %28 = vadd.xlane.f32.xlu1 %v27_v11 }
  0x89   :  { %v447_v12 = vpop.eup %446 }
  0x8a   :  { %v30_v13 = vsel %vm14_vm0, %v447_v12, 0.0 }
  0x8b   :  { %31 = vadd.xlane.f32.xlu1 %v30_v13 }
  0xf6   :  { %v29_v14 = vpop.xlane.xlu1 %28 }
  0xf7   :  { %448 = vrcp.f32 %v29_v14  ;;  %v44_v19 = vand.u32 2147483648, %v29_v14  ;;  %v42_v21 = vand.u32 2147483647, %v29_v14  ;;  %vm38_vm2 = vweird.f32 %v29_v14 }
  0xf9   :  { %v45_v24 = vor.u32 1.1754944e-38, %v44_v19  ;;  %vm43_vm4 = vcmp.eq.f32.partialorder %v42_v21, 8.507059e+37 }
  0xfd   :  { %v449_v15 = vpop.eup %448 }
  0xfe   :  { %v34_v16 = vmul.f32 %v449_v15, %v29_v14  ;;  %v32_v17 = vpop.xlane.xlu1 %31  ;;  %vm39_vm1 = vweird.f32 %v449_v15 }
  0xff   :  { %450 = vrcp.f32 %v32_v17  ;;  %vm40_vm3 = vmor %vm38_vm2, %vm39_vm1  ;;  %v59_v30 = vand.u32 2147483648, %v32_v17  ;;  %v57_v32 = vand.u32 2147483647, %v32_v17  ;;  %vm53_vm6 = vweird.f32 %v32_v17 }
 0x100   :  { %v35_v18 = vsub.f32 1.0, %v34_v16  ;;  %vm71_vm1 = vcmp.le.s32.totalorder %v66_v42, %v64_v41  ;;  %vm184_vm2 = vcmask 130048  }
 0x101   :  { %v60_v35 = vor.u32 1.1754944e-38, %v59_v30  ;;  %vm58_vm8 = vcmp.eq.f32.partialorder %v57_v32, 8.507059e+37  ;;  %v399_v57 = vsel %vm71_vm1, 1.0, %v478_v43 }
 0x102   :  { %v36_v20 = vmul.f32 %v449_v15, %v35_v18 }
 0x104   :  { %v37_v22 = vadd.f32 %v449_v15, %v36_v20 }
 0x105   :  { %v451_v23 = vpop.eup %450 }
 0x106   :  { %v41_v25 = vsel %vm40_vm3, %v449_v15, %v37_v22  ;;  %v49_v26 = vmul.f32 %v451_v23, %v32_v17  ;;  %vm54_vm5 = vweird.f32 %v451_v23 }
 0x107   :  { %v46_v27 = vsel %vm43_vm4, %v45_v24, %v41_v25  ;;  %vm55_vm7 = vmor %vm53_vm6, %vm54_vm5  ;;  %vm72_vm4 = vcmp.le.s32.totalorder %v66_v42, %v70_v59 }
 0x108   :  { %v50_v28 = vsub.f32 1.0, %v49_v26  ;;  %v510_v29 = vmul.f32 %v445_v9, %v46_v27  ;;  %v400_v61 = vsel %vm72_vm4, 1.0, %v478_v43 }
 0x10a   :  { %v51_v31 = vmul.f32 %v451_v23, %v50_v28  ;;  %v78_v33 = vsel %vm14_vm0, %v510_v29, -inf }
 0x10b   :  { %79 = vmax.xlane.f32.xlu2 %v78_v33 }
 0x10c   :  { %v52_v34 = vadd.f32 %v451_v23, %v51_v31 }
 0x10e   :  { %v56_v36 = vsel %vm55_vm7, %v451_v23, %v52_v34 }
 0x10f   :  { %v61_v37 = vsel %vm58_vm8, %v60_v35, %v56_v36 }
 0x110   :  { %v514_v38 = vmul.f32 %v447_v12, %v61_v37 }
 0x112   :  { %v81_v39 = vsel %vm14_vm0, %v514_v38, -inf }
 0x113   :  { %82 = vmax.xlane.f32.xlu2 %v81_v39 }
 0x17e   :  { %v80_v45 = vpop.xlane.xlu2 %79 }
 0x17f   :  { %vm84_vm11 = vcmp.eq.f32.partialorder %v510_v29, %v80_v45 }
 0x180   :  { %v401_v46 = vsel %vm84_vm11, 1.0, %v478_v43 }
 0x181   :  { %404 = vmatmul.msk.f32.vlgmr.msra.gmra.mxu0 %vm14_vm0, %v401_v46 }
 0x186   :  { %v83_v47 = vpop.xlane.xlu2 %82 }
 0x187   :  { %vm85_vm12 = vcmp.eq.f32.partialorder %v514_v38, %v83_v47 }
 0x188   :  { %v402_v48 = vsel %vm85_vm12, 1.0, %v478_v43 }
 0x189   :  { %405 = vmatmul.msk.f32.gmra.mxu0 %vm14_vm0, %v402_v48 }
 0x1fe   :  { %v117_v49 = vpop.f32.mrf.mxu0 }
 0x1ff   :  { %vm123_vm13 = vcmp.lt.f32.partialorder %v117_v49, 1.5 }
 0x200   :  { %v406_v50 = vsel %vm123_vm13, 1.0, %v478_v43 }
 0x201   :  { %v526_v51 = vmul.f32 %v406_v50, %v401_v46 }
 0x203   :  { %vm131_vm14 = vcmp.gt.f32.partialorder %v526_v51, 0.0  ;;  %v241_v30 = vsel %vm14_vm0, %v526_v51, 0.0 }
 0x204   :  { %v133_v52 = vsel %vm131_vm14, -inf, %v510_v29  ;;  %vm288_vm14 = vcmask 24576  }
 0x205   :  { %v135_v53 = vsel %vm14_vm0, %v133_v52, -inf }
 0x206   :  { %136 = vmax.xlane.f32.xlu0 %v135_v53  ;;  %v120_v54 = vpop.f32.mrf.mxu0 }
 0x207   :  { %vm124_vm15 = vcmp.lt.f32.partialorder %v120_v54, 1.5 }
 0x208   :  { %v407_v55 = vsel %vm124_vm15, 1.0, %v478_v43 }
 0x209   :  { %v130_v56 = vmul.f32 %v407_v55, %v402_v48 }
 0x20b   :  { %205 = vmatpush.msra.mxu2 %v130_v56  ;;  %vm132_vm3 = vcmp.gt.f32.partialorder %v130_v56, 0.0  ;;  %v242_v28 = vsel %vm14_vm0, %v130_v56, 0.0 }
 0x20c   :  { %v134_v58 = vsel %vm132_vm3, -inf, %v514_v38  ;;  %v243_v31 = vadd.f32 %v242_v28, %v241_v30  ;;  %vm309_vm3 = vcmask 15360  }
 0x20d   :  { %206 = vmatpush.msra.mxu2 %v526_v51  ;;  %v138_v60 = vsel %vm14_vm0, %v134_v58, -inf }
 0x20e   :  { %415 = vmatmul.msk.f32.vlgmr.msra.gmra.mxu2 %vm184_vm2, %v399_v57  ;;  %139 = vmax.xlane.f32.xlu1 %v138_v60  ;;  %v244_v32 = vrot.slane %v243_v31, 4 }
 0x210   :  { %v245_v33 = vadd.f32 %v244_v32, %v243_v31 }
 0x212   :  { %v246_v34 = vrot.slane %v245_v33, 2 }
 0x214   :  { %v247_v35 = vadd.f32 %v246_v34, %v245_v33 }
 0x216   :  { %416 = vmatmul.msk.f32.gmra.mxu2 %vm184_vm2, %v400_v61  ;;  %v248_v36 = vrot.slane %v247_v35, 1 }
 0x218   :  { %v249_v40 = vadd.f32 %v248_v36, %v247_v35 }
 0x279   :  { %v137_v62 = vpop.xlane.xlu0 %136 }
 0x27a   :  { %vm141_vm5 = vcmp.eq.f32.partialorder %v133_v52, %v137_v62 }
 0x27b   :  { %v408_v63 = vsel %vm141_vm5, 1.0, %v478_v43 }
 0x27c   :  { %411 = vmatmul.msk.f32.vlgmr.msra.gmra.mxu1 %vm14_vm0, %v408_v63 }
 0x281   :  { %v140_v0 = vpop.xlane.xlu1 %139 }
 0x282   :  { %vm142_vm6 = vcmp.eq.f32.partialorder %v134_v58, %v140_v0 }
 0x283   :  { %v409_v1 = vsel %vm142_vm6, 1.0, %v478_v43 }
 0x284   :  { %412 = vmatmul.msk.f32.gmra.mxu1 %vm14_vm0, %v409_v1 }
 0x291   :  { %v208_v2 = vpop.f32.mrf.mxu2 }
 0x292   :  { %v417_v3 = vadd.f32 -1.0, %v208_v2 }
 0x294   :  { %vm252_vm7 = vcmp.lt.f32.partialorder %v417_v3, 16.0 }
 0x295   :  { %v423_v5 = vsel %vm252_vm7, 1.0, %v478_v43 }
 0x296   :  { %v547_v6 = vmul.f32 %v423_v5, %v526_v51 }
 0x298   :  { %v268_v7 = vsel %vm14_vm0, %v547_v6, 0.0  ;;  %v336_v8 = vmul.f32 %v417_v3, %v547_v6  ;;  %v320_v9 = vmul.f32 %v547_v6, %v543_v4  ;;  %v290_v3 = vmul.f32 %v547_v6, %v510_v29 }
 0x299   :  { %v211_v10 = vpop.f32.mrf.mxu2  ;;  %312 = vadd.xlane.f32.xlu1 %v268_v7 }
 0x29a   :  { %v418_v11 = vadd.f32 -1.0, %v211_v10  ;;  %v338_v12 = vsel %vm14_vm0, %v336_v8, 0.0  ;;  %v322_v13 = vsel %vm14_vm0, %v320_v9, 0.0  ;;  %v292_v10 = vsel %vm14_vm0, %v290_v3, 0.0 }
 0x29b   :  { %339 = vadd.xlane.f32.xlu0 %v338_v12  ;;  %323 = vadd.xlane.f32.xlu2 %v322_v13 }
 0x29c   :  { %vm253_vm8 = vcmp.lt.f32.partialorder %v418_v11, 16.0 }
 0x29d   :  { %v424_v14 = vsel %vm253_vm8, 1.0, %v478_v43 }
 0x29e   :  { %v557_v15 = vmul.f32 %v424_v14, %v130_v56 }
 0x2a0   :  { %v337_v16 = vmul.f32 %v418_v11, %v557_v15  ;;  %v321_v17 = vmul.f32 %v557_v15, %v543_v4  ;;  %v269_v18 = vsel %vm14_vm0, %v557_v15, 0.0 }
 0x2a1   :  { %v270_v19 = vadd.f32 %v269_v18, %v268_v7 }
 0x2a2   :  { %v325_v20 = vsel %vm14_vm0, %v321_v17, 0.0  ;;  %v341_v21 = vsel %vm14_vm0, %v337_v16, 0.0 }
 0x2a3   :  { %326 = vadd.xlane.f32.xlu0 %v325_v20  ;;  %314 = vadd.xlane.f32.xlu2 %v269_v18  ;;  %v271_v50 = vrot.slane %v270_v19, 4 }
 0x2a4   :  { %342 = vadd.xlane.f32.xlu1 %v341_v21 }
 0x2a5   :  { %v272_v54 = vadd.f32 %v271_v50, %v270_v19 }
 0x2a7   :  { %v273_v60 = vrot.slane %v272_v54, 2 }
 0x2f9   :  { %v170_v22 = vpop.f32.mrf.mxu1 }
 0x2fa   :  { %vm176_vm9 = vcmp.lt.f32.partialorder %v170_v22, 1.5 }
 0x2fb   :  { %v413_v24 = vsel %vm176_vm9, 1.0, %v478_v43 }
 0x2fc   :  { %v182_v27 = vmul.f32 %v413_v24, %v408_v63 }
 0x301   :  { %v173_v23 = vpop.f32.mrf.mxu1 }
 0x302   :  { %vm177_vm10 = vcmp.lt.f32.partialorder %v173_v23, 1.5 }
 0x303   :  { %v414_v25 = vsel %vm177_vm10, 1.0, %v478_v43 }
 0x304   :  { %v183_v26 = vmul.f32 %v414_v25, %v409_v1  ;;  %v274_v1 = vadd.f32 %v273_v60, %v272_v54 }
 0x306   :  { %230 = vmatpush.msra.mxu3 %v183_v26  ;;  %v275_v7 = vrot.slane %v274_v1, 1 }
 0x308   :  { %231 = vmatpush.msra.mxu3 %v182_v27  ;;  %v276_v13 = vadd.f32 %v275_v7, %v274_v1 }
 0x309   :  { %419 = vmatmul.msk.f32.vlgmr.msra.gmra.mxu3 %vm184_vm2, %v399_v57 }
 0x30c   :  { %v313_v21 = vpop.xlane.xlu1 %312 }
 0x30d   :  { %vm352_vm15 = vcmp.gt.f32.partialorder %v313_v21, 0.5 }
 0x30e   :  { %v340_v20 = vpop.xlane.xlu0 %339 }
 0x311   :  { %420 = vmatmul.msk.f32.gmra.mxu3 %vm184_vm2, %v400_v61 }
 0x316   :  { %v327_v24 = vpop.xlane.xlu0 %326 }
 0x317   :  { %v343_v23 = vpop.xlane.xlu1 %342  ;;  %v355_v34 = vmul.f32 16.0, %v327_v24 }
 0x38c   :  { %v233_v37 = vpop.f32.mrf.mxu3 }
 0x38d   :  { %v421_v39 = vadd.f32 -1.0, %v233_v37 }
 0x38f   :  { %v250_v41 = vadd.f32 %v421_v39, %v249_v40 }
 0x391   :  { %vm260_vm11 = vcmp.lt.f32.partialorder %v250_v41, 16.0 }
 0x392   :  { %v425_v42 = vsel %vm260_vm11, 1.0, %v478_v43 }
 0x393   :  { %v266_v44 = vmul.f32 %v425_v42, %v182_v27 }
 0x394   :  { %v236_v45 = vpop.f32.mrf.mxu3 }
 0x395   :  { %v422_v46 = vadd.f32 -1.0, %v236_v45  ;;  %v277_v47 = vsel %vm14_vm0, %v266_v44, 0.0  ;;  %v344_v48 = vmul.f32 %v266_v44, %v250_v41  ;;  %v328_v49 = vmul.f32 %v266_v44, %v543_v4 }
 0x396   :  { %316 = vadd.xlane.f32.xlu0 %v277_v47  ;;  %v298_v5 = vmul.f32 %v266_v44, %v510_v29  ;;  %v357_v41 = vadd.f32 %v355_v34, %v343_v23 }
 0x397   :  { %v251_v51 = vadd.f32 %v422_v46, %v249_v40  ;;  %v346_v52 = vsel %vm14_vm0, %v344_v48, 0.0  ;;  %v330_v53 = vsel %vm14_vm0, %v328_v49, 0.0 }
 0x398   :  { %347 = vadd.xlane.f32.xlu2 %v346_v52  ;;  %331 = vadd.xlane.f32.xlu1 %v330_v53  ;;  %v300_v12 = vsel %vm14_vm0, %v298_v5, 0.0 }
 0x399   :  { %vm261_vm12 = vcmp.lt.f32.partialorder %v251_v51, 16.0 }
 0x39a   :  { %v426_v55 = vsel %vm261_vm12, 1.0, %v478_v43  ;;  %v291_v43 = vmul.f32 %v557_v15, %v514_v38 }
 0x39b   :  { %v267_v56 = vmul.f32 %v426_v55, %v183_v26 }
 0x39c   :  { %v295_v9 = vsel %vm14_vm0, %v291_v43, 0.0 }
 0x39d   :  { %v345_v57 = vmul.f32 %v267_v56, %v251_v51  ;;  %v329_v58 = vmul.f32 %v267_v56, %v543_v4  ;;  %v278_v59 = vsel %vm14_vm0, %v267_v56, 0.0  ;;  %v299_v15 = vmul.f32 %v267_v56, %v514_v38  ;;  %v324_v38 = vpop.xlane.xlu2 %323 }
 0x39e   :  { %v279_v61 = vadd.f32 %v278_v59, %v277_v47  ;;  %v354_v25 = vmul.f32 16.0, %v324_v38 }
 0x39f   :  { %v349_v62 = vsel %vm14_vm0, %v345_v57, 0.0  ;;  %v333_v63 = vsel %vm14_vm0, %v329_v58, 0.0  ;;  %v303_v17 = vsel %vm14_vm0, %v299_v15, 0.0  ;;  %vm306_vm0 = vcmask 7168  }
 0x3a0   :  { %350 = vadd.xlane.f32.xlu0 %v349_v62  ;;  %334 = vadd.xlane.f32.xlu2 %v333_v63  ;;  %v280_v0 = vrot.slane %v279_v61, 4  ;;  %v356_v28 = vadd.f32 %v354_v25, %v340_v20 }
 0x3a1   :  { %318 = vadd.xlane.f32.xlu1 %v278_v59 }
 0x3a2   :  { %v281_v2 = vadd.f32 %v280_v0, %v279_v61  ;;  %v358_v33 = vsel %vm352_vm15, %v356_v28, -1.0 }
 0x3a4   :  { %v282_v4 = vrot.slane %v281_v2, 2 }
 0x3a5   :  { %v315_v22 = vpop.xlane.xlu2 %314 }
 0x3a6   :  { %v283_v8 = vadd.f32 %v282_v4, %v281_v2  ;;  %vm353_vm4 = vcmp.gt.f32.partialorder %v315_v22, 0.5 }
 0x3a7   :  { %v359_v49 = vsel %vm353_vm4, %v357_v41, -1.0 }
 0x3a8   :  { %v284_v11 = vrot.slane %v283_v8, 1  ;;  %296 = vadd.xlane.f32.xlu0 %v295_v9  ;;  %293 = vadd.xlane.f32.xlu2 %v292_v10 }
 0x3a9   :  { %301 = vadd.xlane.f32.xlu1 %v300_v12 }
 0x3aa   :  { %v285_v14 = vadd.f32 %v284_v11, %v283_v8 }
 0x3ac   :  { %v286_v6 = vadd.f32 %v285_v14, %v276_v13 }
 0x3ae   :  { %vm427_vm13 = vcmp.lt.s32.totalorder %v286_v6, 0  ;;  %v428_v16 = vceil.f32 %v286_v6  ;;  %v429_v29 = vfloor.f32 %v286_v6 }
 0x3b0   :  { %304 = vadd.xlane.f32.xlu2 %v303_v17  ;;  %v430_v18 = vsel %vm427_vm13, %v428_v16, %v429_v29 }
 0x3b1   :  { %v431_v19 = vcvt.f32.s32 %v430_v18 }
 0x3b3   :  { %289 = vst.msk [vmem:[#allocation2] sm:$0x1] %vm288_vm14, %v431_v19 }
 0x3b4   :  { %384 = dma.vmem_to_hbm [thread:$0]  %s380_s16, 16, %s382_s19, [#allocation3]  }
 0x409   :  { %v317_v30 = vpop.xlane.xlu0 %316 }
 0x40a   :  { %vm360_vm1 = vcmp.gt.f32.partialorder %v317_v30, 0.5 }
 0x40b   :  { %v348_v26 = vpop.xlane.xlu2 %347  ;;  %v332_v27 = vpop.xlane.xlu1 %331 }
 0x40c   :  { %v362_v31 = vmul.f32 16.0, %v332_v27 }
 0x40e   :  { %v364_v32 = vadd.f32 %v362_v31, %v348_v26 }
 0x410   :  { %v366_v35 = vsel %vm360_vm1, %v364_v32, -1.0 }
 0x411   :  { %v368_v36 = vsel %vm306_vm0, %v358_v33, %v366_v35 }
 0x412   :  { %vm432_vm2 = vcmp.lt.s32.totalorder %v368_v36, 0  ;;  %v433_v37 = vceil.f32 %v368_v36  ;;  %v434_v39 = vfloor.f32 %v368_v36 }
 0x413   :  { %v335_v40 = vpop.xlane.xlu2 %334  ;;  %v351_v46 = vpop.xlane.xlu0 %350 }
 0x414   :  { %v363_v42 = vmul.f32 16.0, %v335_v40  ;;  %v319_v44 = vpop.xlane.xlu1 %318  ;;  %v435_v45 = vsel %vm432_vm2, %v433_v37, %v434_v39 }
 0x415   :  { %v436_v47 = vcvt.f32.s32 %v435_v45  ;;  %vm361_vm5 = vcmp.gt.f32.partialorder %v319_v44, 0.5 }
 0x416   :  { %v365_v48 = vadd.f32 %v363_v42, %v351_v46 }
 0x417   :  { %372 = vst.msk [vmem:[%s619_s3] sm:$0xff] %vm309_vm3, %v436_v47 }
 0x418   :  { %v367_v50 = vsel %vm361_vm5, %v365_v48, -1.0 }
 0x419   :  { %v369_v51 = vsel %vm306_vm0, %v359_v49, %v367_v50 }
 0x41a   :  { %vm437_vm6 = vcmp.lt.s32.totalorder %v369_v51, 0  ;;  %v438_v52 = vceil.f32 %v369_v51  ;;  %v439_v53 = vfloor.f32 %v369_v51 }
 0x41b   :  { %v294_v54 = vpop.xlane.xlu2 %293  ;;  %v297_v59 = vpop.xlane.xlu0 %296 }
 0x41c   :  { %v440_v55 = vsel %vm437_vm6, %v438_v52, %v439_v53  ;;  %v302_v56 = vpop.xlane.xlu1 %301 }
 0x41d   :  { %v441_v57 = vcvt.f32.s32 %v440_v55  ;;  %v307_v58 = vsel %vm306_vm0, %v294_v54, %v302_v56 }
 0x41e   :  { %310 = vst.msk [vmem:[%s618_s2] sm:$0xff] %vm309_vm3, %v307_v58 }
 0x41f   :  { %373 = vst.msk [vmem:[%s619_s3 + $0x8] sm:$0xff] %vm309_vm3, %v441_v57 }
 0x423   :  { %v305_v60 = vpop.xlane.xlu2 %304 }
 0x424   :  { %v308_v61 = vsel %vm306_vm0, %v297_v59, %v305_v60 }
 0x425   :  { %311 = vst.msk [vmem:[%s618_s2 + $0x8] sm:$0xff] %vm309_vm3, %v308_v61 }
 0x426   :  { %476 = dma.done.wait [#allocation3], 16  }
 0x427   :  { %477 = vsyncadd [#allocation3], 4294967280 }
 0x428   :  { %397 = vsyncpa [#allocation3], 1 }

</bundles_post_ra>
